<compile_context>
chip_gen: v7x
topology: tpu7x:2x2x1
jax: 0.10.0
libtpu: 0.0.40
codegen_flags: <defaults>
</compile_context>

<pallas_src>
import math
import jax
import jax.numpy as jnp
from jax.experimental import pallas as pl
from jax.experimental.pallas import tpu as pltpu


def _round_up(x, m):
    return ((x + m - 1) // m) * m


def _cdiv(a, b):
    return (a + b - 1) // b


# ---------------------------------------------------------------------------
# Kernel: 3 fused matmuls + tanh, lane-dense outputs.
# ---------------------------------------------------------------------------
def _fused_mlp(x_ref, w1_ref, b1_ref, w2_ref, b2_ref, wh_ref, bh_ref):
    """Shared body: returns (h2_f32, head_f32)."""
    cdt = w1_ref.dtype                       # MXU operand dtype (bf16 by default)
    x = x_ref[...].astype(cdt)

    # fused layer 1: [ha1 | hc1] = tanh(x @ [wa1 | wc1] + [ba1 | bc1])
    h1 = jnp.tanh(
        jnp.dot(x, w1_ref[...], preferred_element_type=jnp.float32) + b1_ref[...]
    )

    # fused layer 2: block-diag(wa2, wc2) keeps actor/critic columns independent
    h2 = jnp.tanh(
        jnp.dot(h1.astype(cdt), w2_ref[...], preferred_element_type=jnp.float32)
        + b2_ref[...]
    )

    # fused heads: lanes [0..A-1]=mean(=action), [A]=value, [A+1]=logp const,
    # rest zero-padded. bias carries bm, bv and the deterministic logp constant.
    head = (
        jnp.dot(h2.astype(cdt), wh_ref[...], preferred_element_type=jnp.float32)
        + bh_ref[...]
    )
    return h2, head


def policy_act_kernel(x_ref, w1_ref, b1_ref, w2_ref, b2_ref, wh_ref, bh_ref,
                      hidden_ref, head_ref):
    h2, head = _fused_mlp(x_ref, w1_ref, b1_ref, w2_ref, b2_ref, wh_ref, bh_ref)
    hidden_ref[...] = h2.astype(hidden_ref.dtype)   # (TB, 2H) lane-dense slab (bf16)
    head_ref[...] = head.astype(head_ref.dtype)     # (TB, 128) lane-dense slab


def policy_act_head_only_kernel(x_ref, w1_ref, b1_ref, w2_ref, b2_ref, wh_ref,
                                bh_ref, head_ref):
    _, head = _fused_mlp(x_ref, w1_ref, b1_ref, w2_ref, b2_ref, wh_ref, bh_ref)
    head_ref[...] = head.astype(head_ref.dtype)


# ---------------------------------------------------------------------------
# Trace-time weight fusion.
# ---------------------------------------------------------------------------
def _fuse_params(params, headp, compute_dtype):
    (wa1, ba1, wa2, ba2, wc1, bc1, wc2, bc2, wv, bv, wm, bm, logstd) = params
    H = wa1.shape[1]
    A = wm.shape[1]

    w1 = jnp.concatenate([wa1, wc1], axis=1)             # (obs, 2H)
    b1 = jnp.concatenate([ba1, bc1], axis=1)              # (1, 2H)

    zH = jnp.zeros((H, H), jnp.float32)
    w2 = jnp.block([[wa2, zH], [zH, wc2]])                # (2H, 2H)
    b2 = jnp.concatenate([ba2, bc2], axis=1)               # (1, 2H)

    wh = jnp.zeros((2 * H, headp), jnp.float32)
    wh = wh.at[:H, :A].set(wm)                            # action mean from ha
    wh = wh.at[H:, A:A + 1].set(wv)                       # value from hc

    # deterministic DiagGaussian logp: quadratic term is identically zero
    logp_const = -0.5 * A * math.log(2.0 * math.pi) - jnp.sum(logstd)

    bh = jnp.zeros((1, headp), jnp.float32)
    bh = bh.at[0, :A].set(bm[0])
    bh = bh.at[0, A].set(bv[0, 0])
    bh = bh.at[0, A + 1].set(logp_const)

    # MXU operands go bf16 (explicit decision per perf review); biases stay f32.
    w1 = w1.astype(compute_dtype)
    w2 = w2.astype(compute_dtype)
    wh = wh.astype(compute_dtype)
    return w1, b1, w2, b2, wh, bh


# ---------------------------------------------------------------------------
# Batch tile selection (balanced, >=2 tiles when it matters, cap 1024).
# ---------------------------------------------------------------------------
def _pick_tile(B, tb_max=1024, min_tiles_for_megacore=2):
    if B < 16:
        n_tiles = 1
    else:
        # at least 2 grid steps so v7x's second TensorCore gets work;
        # balanced tiles keep padding to < 8 rows per tile.
        n_tiles = max(min_tiles_for_megacore, _cdiv(B, tb_max))
    tb = _round_up(_cdiv(B, n_tiles), 8)
    bp = tb * _cdiv(B, tb)
    return tb, bp


# ---------------------------------------------------------------------------
# Wrapper: fused act(deterministic=True).
# ---------------------------------------------------------------------------
def policy_act(x, params, states, *, return_hidden=True,
               compute_dtype=jnp.bfloat16, hidden_dtype=jnp.bfloat16,
               head_dtype=jnp.float32):
    """Returns (value, action, action_log_probs, states, hidden_actor, hidden_critic).

    Slab lane layout (for callers that want to avoid re-slicing the outputs):
      hidden slab (B, 2H):  [:, :H] = hidden_actor, [:, H:] = hidden_critic
      head   slab (B, 128): [:, :A] = action/mean, [:, A] = value, [:, A+1] = logp
    When `return_hidden=False` the hidden slab is never written (halves HBM
    writeback) and hidden_actor/hidden_critic are returned as None.
    """
    (wa1, ba1, wa2, ba2, wc1, bc1, wc2, bc2, wv, bv, wm, bm, logstd) = params
    B, obs = x.shape
    H = wa1.shape[1]
    A = wm.shape[1]
    H2 = 2 * H
    HEADP = max(128, _round_up(A + 2, 128))               # lane-dense head slab

    w1, b1, w2, b2, wh, bh = _fuse_params(params, HEADP, compute_dtype)

    TB, Bp = _pick_tile(B)
    xp = x if Bp == B else jnp.pad(x, ((0, Bp - B), (0, 0)))
    grid = (Bp // TB,)

    # Working set per step (TB=1024, f32 x, bf16 weights/hidden, f32 head) is
    # well under 6 MiB -> far below every generation's scoped VMEM limit.
    in_specs = [
        pl.BlockSpec((TB, obs), lambda i: (i, 0)),         # x: batch-tiled
        pl.BlockSpec((obs, H2), lambda i: (0, 0)),         # fused W1 (resident)
        pl.BlockSpec((1, H2), lambda i: (0, 0)),
        pl.BlockSpec((H2, H2), lambda i: (0, 0)),          # fused W2 (resident)
        pl.BlockSpec((1, H2), lambda i: (0, 0)),
        pl.BlockSpec((H2, HEADP), lambda i: (0, 0)),       # fused head (resident)
        pl.BlockSpec((1, HEADP), lambda i: (0, 0)),
    ]

    w_itemsize = jnp.dtype(compute_dtype).itemsize
    in_bytes = (Bp * obs * 4
                + (w1.size + w2.size + wh.size) * w_itemsize
                + (b1.size + b2.size + bh.size) * 4)
    out_bytes = Bp * HEADP * jnp.dtype(head_dtype).itemsize
    if return_hidden:
        out_bytes += Bp * H2 * jnp.dtype(hidden_dtype).itemsize
    cost = pl.CostEstimate(
        flops=2 * Bp * (obs * H2 + H2 * H2 + H2 * HEADP),
        transcendentals=2 * Bp * H2,
        bytes_accessed=in_bytes + out_bytes,
    )

    compiler_params = pltpu.CompilerParams(dimension_semantics=("parallel",))

    if return_hidden:
        out_shape = (
            jax.ShapeDtypeStruct((Bp, H2), hidden_dtype),    # [ha | hc]
            jax.ShapeDtypeStruct((Bp, HEADP), head_dtype),   # [action|value|logp|pad]
        )
        out_specs = [
            pl.BlockSpec((TB, H2), lambda i: (i, 0)),
            pl.BlockSpec((TB, HEADP), lambda i: (i, 0)),
        ]
        hidden, head = pl.pallas_call(
            policy_act_kernel,
            out_shape=out_shape,
            grid=grid,
            in_specs=in_specs,
            out_specs=out_specs,
            compiler_params=compiler_params,
            cost_estimate=cost,
        )(xp, w1, b1, w2, b2, wh, bh)
    else:
        out_shape = jax.ShapeDtypeStruct((Bp, HEADP), head_dtype)
        out_specs = pl.BlockSpec((TB, HEADP), lambda i: (i, 0))
        head = pl.pallas_call(
            policy_act_head_only_kernel,
            out_shape=out_shape,
            grid=grid,
            in_specs=in_specs,
            out_specs=out_specs,
            compiler_params=compiler_params,
            cost_estimate=cost,
        )(xp, w1, b1, w2, b2, wh, bh)
        hidden = None

    # Fast path when there is no batch padding: only the contractual column
    # slices are taken (padded rows contain tanh(bias) garbage and must never
    # escape the [:B] view).
    head_b = head if Bp == B else head[:B]
    action = head_b[:, :A]
    value = head_b[:, A:A + 1]
    logp = head_b[:, A + 1:A + 2]

    if return_hidden:
        hidden_b = hidden if Bp == B else hidden[:B]
        ha = hidden_b[:, :H]
        hc = hidden_b[:, H:]
    else:
        ha = None
        hc = None

    # states pass through unchanged (non-recurrent policy)
    return value, action, logp, states, ha, hc


# ---------------------------------------------------------------------------
# Parameter init + pure-JAX reference of the same act() semantics.
# ---------------------------------------------------------------------------
def init_params(key, obs_dim, hidden, action_dim):
    ks = jax.random.split(key, 7)
    s = 0.1
    wa1 = s * jax.random.normal(ks[0], (obs_dim, hidden), jnp.float32)
    ba1 = jnp.zeros((1, hidden), jnp.float32)
    wa2 = s * jax.random.normal(ks[1], (hidden, hidden), jnp.float32)
    ba2 = jnp.zeros((1, hidden), jnp.float32)
    wc1 = s * jax.random.normal(ks[2], (obs_dim, hidden), jnp.float32)
    bc1 = jnp.zeros((1, hidden), jnp.float32)
    wc2 = s * jax.random.normal(ks[3], (hidden, hidden), jnp.float32)
    bc2 = jnp.zeros((1, hidden), jnp.float32)
    wv = s * jax.random.normal(ks[4], (hidden, 1), jnp.float32)
    bv = jnp.zeros((1, 1), jnp.float32)
    wm = s * jax.random.normal(ks[5], (hidden, action_dim), jnp.float32)
    bm = jnp.zeros((1, action_dim), jnp.float32)
    logstd = jnp.zeros((1, action_dim), jnp.float32)
    return (wa1, ba1, wa2, ba2, wc1, bc1, wc2, bc2, wv, bv, wm, bm, logstd)


def policy_act_ref(x, params, states):
    (wa1, ba1, wa2, ba2, wc1, bc1, wc2, bc2, wv, bv, wm, bm, logstd) = params
    ha = jnp.tanh(x @ wa1 + ba1)
    ha = jnp.tanh(ha @ wa2 + ba2)
    hc = jnp.tanh(x @ wc1 + bc1)
    hc = jnp.tanh(hc @ wc2 + bc2)
    value = hc @ wv + bv
    mean = ha @ wm + bm
    action = mean
    elem = (
        -0.5 * (action - mean) ** 2 * jnp.exp(-2.0 * logstd)
        - 0.5 * math.log(2.0 * math.pi)
        - logstd
    )
    logp = jnp.sum(elem, axis=-1, keepdims=True) * jnp.ones((x.shape[0], 1), jnp.float32)
    return value, action, logp, states, ha, hc


if __name__ == "__main__":
    key = jax.random.PRNGKey(0)
    k_x, k_p, k_s = jax.random.split(key, 3)

    batch, obs_dim, hidden, action_dim = 8, 32, 64, 8
    x = jax.random.normal(k_x, (batch, obs_dim), jnp.float32)
    states = jax.random.normal(k_s, (batch, hidden), jnp.float32)
    params = init_params(k_p, obs_dim, hidden, action_dim)

    # full act(): hidden slab returned
    out = jax.block_until_ready(policy_act(x, params, states))
    value, action, logp, st, ha, hc = out

    # rollout fast path: hidden-slab writeback skipped entirely
    out2 = jax.block_until_ready(policy_act(x, params, states, return_hidden=False))
    value2, action2, logp2, _, ha2, hc2 = out2

    rv, ra, rl, rs, rha, rhc = policy_act_ref(x, params, states)

    # bf16 MXU operands + bf16 hidden slab -> bf16-level agreement with the
    # pure-f32 reference; logp is a constant carried in the f32 head bias.
    tol = dict(atol=5e-2, rtol=5e-2)
    assert value.shape == rv.shape and jnp.allclose(value, rv, **tol)
    assert action.shape == ra.shape and jnp.allclose(action, ra, **tol)
    assert logp.shape == rl.shape and jnp.allclose(logp, rl, atol=1e-4, rtol=1e-4)
    assert st.shape == rs.shape and jnp.allclose(st, rs)
    assert ha.shape == rha.shape and jnp.allclose(ha.astype(jnp.float32), rha, **tol)
    assert hc.shape == rhc.shape and jnp.allclose(hc.astype(jnp.float32), rhc, **tol)

    # head-only path must agree with the full path bit-for-bit (same math)
    assert ha2 is None and hc2 is None
    assert jnp.allclose(value2, value) and jnp.allclose(action2, action)
    assert jnp.allclose(logp2, logp)

    print("KERNEL_OK")
</pallas_src>

<mosaic_0001>
module attributes {stable_mosaic.version = 11 : i64} {
  func.func @policy_act_kernel(%arg0: i32, %arg1: memref<8x32xf32, #tpu.memory_space<vmem>>, %arg2: memref<32x128xbf16, #tpu.memory_space<vmem>>, %arg3: memref<1x128xf32, #tpu.memory_space<vmem>>, %arg4: memref<128x128xbf16, #tpu.memory_space<vmem>>, %arg5: memref<1x128xf32, #tpu.memory_space<vmem>>, %arg6: memref<128x128xbf16, #tpu.memory_space<vmem>>, %arg7: memref<1x128xf32, #tpu.memory_space<vmem>>, %arg8: memref<8x128xbf16, #tpu.memory_space<vmem>>, %arg9: memref<8x128xf32, #tpu.memory_space<vmem>>) attributes {dimension_semantics = [#tpu.dimension_semantics<parallel>], iteration_bounds = array<i64: 1>, scalar_prefetch = 0 : i64, scratch_operands = 0 : i64, tpu.core_type = #tpu.core_type<tc>, window_params = [{transform_indices = @transform_0, window_bounds = array<i64: 8, 32>}, {pipeline_mode = #tpu.pipeline_mode<synchronous>, transform_indices = @transform_1, window_bounds = array<i64: 32, 128>}, {pipeline_mode = #tpu.pipeline_mode<synchronous>, transform_indices = @transform_2, window_bounds = array<i64: 1, 128>}, {pipeline_mode = #tpu.pipeline_mode<synchronous>, transform_indices = @transform_3, window_bounds = array<i64: 128, 128>}, {pipeline_mode = #tpu.pipeline_mode<synchronous>, transform_indices = @transform_4, window_bounds = array<i64: 1, 128>}, {pipeline_mode = #tpu.pipeline_mode<synchronous>, transform_indices = @transform_5, window_bounds = array<i64: 128, 128>}, {pipeline_mode = #tpu.pipeline_mode<synchronous>, transform_indices = @transform_6, window_bounds = array<i64: 1, 128>}, {transform_indices = @transform_7, window_bounds = array<i64: 8, 128>}, {transform_indices = @transform_8, window_bounds = array<i64: 8, 128>}]} {
    %c0 = arith.constant 0 : index
    %c0_0 = arith.constant 0 : index
    %0 = vector.load %arg1[%c0, %c0_0] : memref<8x32xf32, #tpu.memory_space<vmem>>, vector<8x32xf32>
    %1 = arith.truncf %0 : vector<8x32xf32> to vector<8x32xbf16>
    %c0_1 = arith.constant 0 : index
    %c0_2 = arith.constant 0 : index
    %2 = vector.load %arg2[%c0_1, %c0_2] : memref<32x128xbf16, #tpu.memory_space<vmem>>, vector<32x128xbf16>
    %cst = arith.constant dense<0.000000e+00> : vector<8x128xf32>
    %3 = tpu.matmul %1, %2, %cst {dimension_numbers = #tpu.dot_dimension_numbers<[1], [0], [0], [1], [0, 0, 1, 1], [], []>} : vector<8x32xbf16>, vector<32x128xbf16>, vector<8x128xf32> -> vector<8x128xf32>
    %c0_3 = arith.constant 0 : index
    %c0_4 = arith.constant 0 : index
    %4 = vector.load %arg3[%c0_3, %c0_4] : memref<1x128xf32, #tpu.memory_space<vmem>>, vector<1x128xf32>
    %5 = vector.broadcast %4 : vector<1x128xf32> to vector<8x128xf32>
    %6 = arith.addf %3, %5 : vector<8x128xf32>
    %7 = math.tanh %6 : vector<8x128xf32>
    %8 = arith.truncf %7 : vector<8x128xf32> to vector<8x128xbf16>
    %c0_5 = arith.constant 0 : index
    %c0_6 = arith.constant 0 : index
    %9 = vector.load %arg4[%c0_5, %c0_6] : memref<128x128xbf16, #tpu.memory_space<vmem>>, vector<128x128xbf16>
    %cst_7 = arith.constant dense<0.000000e+00> : vector<8x128xf32>
    %10 = tpu.matmul %8, %9, %cst_7 {dimension_numbers = #tpu.dot_dimension_numbers<[1], [0], [0], [1], [0, 0, 1, 1], [], []>} : vector<8x128xbf16>, vector<128x128xbf16>, vector<8x128xf32> -> vector<8x128xf32>
    %c0_8 = arith.constant 0 : index
    %c0_9 = arith.constant 0 : index
    %11 = vector.load %arg5[%c0_8, %c0_9] : memref<1x128xf32, #tpu.memory_space<vmem>>, vector<1x128xf32>
    %12 = vector.broadcast %11 : vector<1x128xf32> to vector<8x128xf32>
    %13 = arith.addf %10, %12 : vector<8x128xf32>
    %14 = math.tanh %13 : vector<8x128xf32>
    %15 = arith.truncf %14 : vector<8x128xf32> to vector<8x128xbf16>
    %c0_10 = arith.constant 0 : index
    %c0_11 = arith.constant 0 : index
    %16 = vector.load %arg6[%c0_10, %c0_11] : memref<128x128xbf16, #tpu.memory_space<vmem>>, vector<128x128xbf16>
    %cst_12 = arith.constant dense<0.000000e+00> : vector<8x128xf32>
    %17 = tpu.matmul %15, %16, %cst_12 {dimension_numbers = #tpu.dot_dimension_numbers<[1], [0], [0], [1], [0, 0, 1, 1], [], []>} : vector<8x128xbf16>, vector<128x128xbf16>, vector<8x128xf32> -> vector<8x128xf32>
    %c0_13 = arith.constant 0 : index
    %c0_14 = arith.constant 0 : index
    %18 = vector.load %arg7[%c0_13, %c0_14] : memref<1x128xf32, #tpu.memory_space<vmem>>, vector<1x128xf32>
    %19 = vector.broadcast %18 : vector<1x128xf32> to vector<8x128xf32>
    %20 = arith.addf %17, %19 : vector<8x128xf32>
    %21 = arith.truncf %14 : vector<8x128xf32> to vector<8x128xbf16>
    %c0_15 = arith.constant 0 : index
    %c0_16 = arith.constant 0 : index
    %22 = vector.load %arg8[%c0_15, %c0_16] : memref<8x128xbf16, #tpu.memory_space<vmem>>, vector<8x128xbf16>
    tpu.vector_store %arg8[%c0_15, %c0_16], %21 {strides = array<i32>} : memref<8x128xbf16, #tpu.memory_space<vmem>>, vector<8x128xbf16>,
    %c0_17 = arith.constant 0 : index
    %c0_18 = arith.constant 0 : index
    %23 = vector.load %arg9[%c0_17, %c0_18] : memref<8x128xf32, #tpu.memory_space<vmem>>, vector<8x128xf32>
    tpu.vector_store %arg9[%c0_17, %c0_18], %20 {strides = array<i32>} : memref<8x128xf32, #tpu.memory_space<vmem>>, vector<8x128xf32>,
    return
  }
  func.func @transform_0(%arg0: i32) -> (i32, i32) {
    %c0_i32 = arith.constant 0 : i32
    %c0_i32_0 = arith.constant 0 : i32
    return %arg0, %c0_i32 : i32, i32
  }
  func.func @transform_1(%arg0: i32) -> (i32, i32) {
    %c0_i32 = arith.constant 0 : i32
    %c0_i32_0 = arith.constant 0 : i32
    %c0_i32_1 = arith.constant 0 : i32
    return %c0_i32, %c0_i32_0 : i32, i32
  }
  func.func @transform_2(%arg0: i32) -> (i32, i32) {
    %c0_i32 = arith.constant 0 : i32
    %c0_i32_0 = arith.constant 0 : i32
    %c0_i32_1 = arith.constant 0 : i32
    return %c0_i32, %c0_i32_0 : i32, i32
  }
  func.func @transform_3(%arg0: i32) -> (i32, i32) {
    %c0_i32 = arith.constant 0 : i32
    %c0_i32_0 = arith.constant 0 : i32
    %c0_i32_1 = arith.constant 0 : i32
    return %c0_i32, %c0_i32_0 : i32, i32
  }
  func.func @transform_4(%arg0: i32) -> (i32, i32) {
    %c0_i32 = arith.constant 0 : i32
    %c0_i32_0 = arith.constant 0 : i32
    %c0_i32_1 = arith.constant 0 : i32
    return %c0_i32, %c0_i32_0 : i32, i32
  }
  func.func @transform_5(%arg0: i32) -> (i32, i32) {
    %c0_i32 = arith.constant 0 : i32
    %c0_i32_0 = arith.constant 0 : i32
    %c0_i32_1 = arith.constant 0 : i32
    return %c0_i32, %c0_i32_0 : i32, i32
  }
  func.func @transform_6(%arg0: i32) -> (i32, i32) {
    %c0_i32 = arith.constant 0 : i32
    %c0_i32_0 = arith.constant 0 : i32
    %c0_i32_1 = arith.constant 0 : i32
    return %c0_i32, %c0_i32_0 : i32, i32
  }
  func.func @transform_7(%arg0: i32) -> (i32, i32) {
    %c0_i32 = arith.constant 0 : i32
    %c0_i32_0 = arith.constant 0 : i32
    return %arg0, %c0_i32 : i32, i32
  }
  func.func @transform_8(%arg0: i32) -> (i32, i32) {
    %c0_i32 = arith.constant 0 : i32
    %c0_i32_0 = arith.constant 0 : i32
    return %arg0, %c0_i32 : i32, i32
  }
}

</mosaic_0001>

<bundles_post_ra>
// kernel: tpu_custom_call.1
= control target key start
LH: loop header
LB: loop body
LE: loop exit
PB: predicated region body
PF: predicated region fallthrough
CT: control target
= control target key end

     0   :  { %14 = vsyncpa [#allocation3], 0  ;;  %s846_s0 = inlined_call_operand.hbm [shape: f32[8,32], index: 0, kind: input, shape index: {}]   ;;  %s847_s1 = inlined_call_operand.hbm [shape: bf16[32,128], index: 1, kind: input, shape index: {}]   ;;  %s848_s2 = inlined_call_operand.vmem [shape: f32[1,128], index: 2, kind: input, shape index: {}]   ;;  %s849_s3 = inlined_call_operand.hbm [shape: bf16[128,128], index: 3, kind: input, shape index: {}]   ;;  %s850_s4 = inlined_call_operand.vmem [shape: f32[1,128], index: 4, kind: input, shape index: {}]   ;;  %s851_s5 = inlined_call_operand.hbm [shape: bf16[128,128], index: 5, kind: input, shape index: {}]   ;;  %s852_s6 = inlined_call_operand.vmem [shape: f32[1,128], index: 6, kind: input, shape index: {}]   ;;  %s853_s7 = inlined_call_operand.hbm [shape: bf16[8,128], index: 7, kind: output, shape index: {0}]   ;;  %s854_s8 = inlined_call_operand.hbm [shape: f32[8,128], index: 8, kind: output, shape index: {1}]  }
   0x1   :  { %15 = vsyncpa [#allocation6], 0 }
   0x2   :  { %16 = vsyncpa [#allocation9], 0 }
   0x3   :  { %17 = vsyncpa [#allocation4], 0 }
   0x4   :  { %18 = vsyncpa [#allocation12], 0  ;;  %s677_s27 = smov [#allocation5]   ;;  %s535_s9 = scalar_lea.hbm %s847_s1, 256 }
   0x5   :  { %s34_s28 = sshll.u32 %s677_s27, 4  ;;  %p536_p0 = scmp.ne.s32.totalorder %s847_s1, %s535_s9  ;;  %s35_s28 = int_to_ptr.vmem [resolvable:$true] %s34_s28 }
   0x6   :  { %p539_p1 = scmp.lt.u32.totalorder %s535_s9, %s847_s1 }
   0x8   :  { %p541_p2 = pnand %p539_p1, %p536_p0 }
   0xa   :  { %544 = shalt.err (!%p541_p2)
}
   0xb   :  { %s545_s14 = scalar_lea.vmem %s35_s28, 256  ;;  %p550_p4 = scmp.lt.s32.totalorder %s35_s28, %s35_s28 }
   0xc   :  { %p546_p3 = scmp.ne.s32.totalorder %s35_s28, %s545_s14  ;;  %p551_p5 = scmp.lt.s32.totalorder %s545_s14, %s545_s14 }
   0xe   :  { %p552_p6 = por %p551_p5, %p550_p4 }
  0x10   :  { %p553_p7 = pnand %p552_p6, %p546_p3 }
  0x12   :  { %556 = shalt.err (!%p553_p7)
}
  0x13   :  { %s678_s15 = smov 64   ;;  %s679_s16 = smov 4  }
  0x14   :  { %40 = dma.hbm_to_vmem [thread:$0]  %s847_s1, 256, %s35_s28, [#allocation6], %s678_s15, %s678_s15, %s679_s16  }
  0x15   :  { %s680_s19 = smov [#allocation2]   ;;  %s681_s21 = smov [#allocation7]  }
  0x16   :  { %s25_s20 = sshll.u32 %s680_s19, 4  ;;  %s48_s22 = sshll.u32 %s681_s21, 4  ;;  %s26_s20 = int_to_ptr.vmem [resolvable:$true] %s25_s20  ;;  %s49_s22 = int_to_ptr.vmem [resolvable:$true] %s48_s22 }
  0x17   :  { %s557_s25 = scalar_lea.hbm %s846_s0, 128 }
  0x18   :  { %p558_p8 = scmp.ne.s32.totalorder %s846_s0, %s557_s25  ;;  %p561_p9 = scmp.lt.u32.totalorder %s557_s25, %s846_s0 }
  0x1a   :  { %p563_p10 = pnand %p561_p9, %p558_p8 }
  0x1c   :  { %566 = shalt.err (!%p563_p10)
}
  0x1d   :  { %s567_s1 = scalar_lea.vmem %s26_s20, 128  ;;  %p572_p12 = scmp.lt.s32.totalorder %s26_s20, %s26_s20 }
  0x1e   :  { %p568_p11 = scmp.ne.s32.totalorder %s26_s20, %s567_s1  ;;  %p573_p13 = scmp.lt.s32.totalorder %s567_s1, %s567_s1 }
  0x20   :  { %p574_p0 = por %p573_p13, %p572_p12 }
  0x22   :  { %p575_p1 = pnand %p574_p0, %p568_p11 }
  0x24   :  { %578 = shalt.err (!%p575_p1)
}
  0x25   :  { %28 = dma.hbm_to_vmem [thread:$0]  %s846_s0, 128, %s26_s20, [#allocation3]  }
  0x26   :  { %s579_s12 = scalar_lea.hbm %s849_s3, 1024 }
  0x27   :  { %p580_p2 = scmp.ne.s32.totalorder %s849_s3, %s579_s12  ;;  %p583_p3 = scmp.lt.u32.totalorder %s579_s12, %s849_s3 }
  0x29   :  { %p585_p4 = pnand %p583_p3, %p580_p2 }
  0x2b   :  { %588 = shalt.err (!%p585_p4)
}
  0x2c   :  { %s589_s19 = scalar_lea.vmem %s49_s22, 1024  ;;  %p594_p6 = scmp.lt.s32.totalorder %s49_s22, %s49_s22 }
  0x2d   :  { %p590_p5 = scmp.ne.s32.totalorder %s49_s22, %s589_s19  ;;  %p595_p7 = scmp.lt.s32.totalorder %s589_s19, %s589_s19 }
  0x2f   :  { %p596_p8 = por %p595_p7, %p594_p6 }
  0x31   :  { %p597_p9 = pnand %p596_p8, %p590_p5 }
  0x33   :  { %600 = shalt.err (!%p597_p9)
}
  0x34   :  { %54 = dma.hbm_to_vmem [thread:$0]  %s849_s3, 1024, %s49_s22, [#allocation6], %s678_s15, %s678_s15, %s679_s16  }
  0x35   :  { %s682_s21 = smov [#allocation8]   ;;  %s601_s26 = scalar_lea.hbm %s851_s5, 1024 }
  0x36   :  { %s62_s23 = sshll.u32 %s682_s21, 4  ;;  %p602_p10 = scmp.ne.s32.totalorder %s851_s5, %s601_s26  ;;  %s63_s23 = int_to_ptr.vmem [resolvable:$true] %s62_s23 }
  0x37   :  { %p605_p11 = scmp.lt.u32.totalorder %s601_s26, %s851_s5 }
  0x39   :  { %p607_p12 = pnand %p605_p11, %p602_p10 }
  0x3b   :  { %610 = shalt.err (!%p607_p12)
}
  0x3c   :  { %s611_s28 = scalar_lea.vmem %s63_s23, 1024  ;;  %p616_p0 = scmp.lt.s32.totalorder %s63_s23, %s63_s23 }
  0x3d   :  { %p612_p13 = scmp.ne.s32.totalorder %s63_s23, %s611_s28  ;;  %p617_p1 = scmp.lt.s32.totalorder %s611_s28, %s611_s28 }
  0x3f   :  { %p618_p2 = por %p617_p1, %p616_p0 }
  0x41   :  { %p619_p3 = pnand %p618_p2, %p612_p13 }
  0x43   :  { %622 = shalt.err (!%p619_p3)
}
  0x44   :  { %68 = dma.hbm_to_vmem [thread:$0]  %s851_s5, 1024, %s63_s23, [#allocation9], %s678_s15, %s678_s15, %s679_s16  }
  0x45   :  { %667 = dma.done.wait [#allocation3], 128  }
  0x46   :  { %668 = vsyncadd [#allocation3], 4294967168 }
  0x47   :  { %669 = dma.done.wait [#allocation6], 1280  }
  0x48   :  { %670 = vsyncadd [#allocation6], 4294966016 }
  0x49   :  { %671 = dma.done.wait [#allocation9], 1024  }
  0x4a   :  { %672 = vsyncadd [#allocation9], 4294966272  ;;  %v683_v0 = vmov 0.0   ;;  %vm684_vm0 = vmmov 0   ;;  %v513_v1 = vld [vmem:[#allocation5] sm:$0xff]   ;;  %v514_v2 = vld [vmem:[#allocation5 + $0x8] sm:$0xff]  }
  0x4b   :  { %455 = vmatprep.subr.bf16.mxu0 %v683_v0  ;;  %459 = vmatprep.mubr.msk.bf16.mxu0 %vm684_vm0, %v683_v0  ;;  %v84_v3 = vld [vmem:[#allocation2] sm:$0xff]  ;;  %v515_v4 = vld [vmem:[#allocation7] sm:$0xff]   ;;  %vm109_vm1 = vcmask 261120   ;;  %v517_v7 = vld [vmem:[#allocation7 + $0x10] sm:$0xff]   ;;  %s685_s9 = smov [#allocation10]  }
  0x4c   :  { %463 = vmatprep.subr.bf16.mxu1 %v683_v0  ;;  %479 = vmatprep.mubr.msk.bf16.mxu1 %vm684_vm0, %v683_v0  ;;  %v85_v5 = vpack.c.bf16 %v84_v3, %v84_v3  ;;  %v516_v6 = vld [vmem:[#allocation7 + $0x8] sm:$0xff]   ;;  %v518_v8 = vld [vmem:[#allocation7 + $0x18] sm:$0xff]   ;;  %v519_v9 = vld [vmem:[#allocation7 + $0x20] sm:$0xff]   ;;  %s387_s10 = sshll.u32 %s685_s9, 4  ;;  %s388_s10 = int_to_ptr.vmem [resolvable:$true] %s387_s10 }
  0x4d   :  { %456 = vmatpush3.bf16.msra.mxu0 %v513_v1  ;;  %464 = vmatpush3.bf16.msra.mxu1 %v515_v4  ;;  %v520_v10 = vld [vmem:[#allocation7 + $0x28] sm:$0xff]   ;;  %v521_v11 = vld [vmem:[#allocation7 + $0x30] sm:$0xff]   ;;  %v522_v12 = vld [vmem:[#allocation7 + $0x38] sm:$0xff]   ;;  %s623_s11 = scalar_lea.vmem %s388_s10, 64  ;;  %p628_p5 = scmp.lt.s32.totalorder %s388_s10, %s388_s10 }
  0x4e   :  { %457 = vmatprep.subr.bf16.mxu0 %v683_v0  ;;  %465 = vmatprep.subr.bf16.mxu1 %v683_v0  ;;  %v523_v13 = vld [vmem:[#allocation8] sm:$0xff]   ;;  %v524_v14 = vld [vmem:[#allocation8 + $0x8] sm:$0xff]   ;;  %v525_v15 = vld [vmem:[#allocation8 + $0x10] sm:$0xff]   ;;  %p624_p4 = scmp.ne.s32.totalorder %s388_s10, %s623_s11  ;;  %p629_p6 = scmp.lt.s32.totalorder %s623_s11, %s623_s11 }
  0x4f   :  { %v526_v16 = vld [vmem:[#allocation8 + $0x18] sm:$0xff]   ;;  %v412_v17 = vld [vmem:[%s848_s2] ss:$0 sm:$0xff]  ;;  %v527_v25 = vld [vmem:[#allocation8 + $0x20] sm:$0xff]  }
  0x50   :  { %v528_v26 = vld [vmem:[#allocation8 + $0x28] sm:$0xff]   ;;  %v529_v27 = vld [vmem:[#allocation8 + $0x30] sm:$0xff]   ;;  %v530_v28 = vld [vmem:[#allocation8 + $0x38] sm:$0xff]   ;;  %p630_p7 = por %p629_p6, %p628_p5 }
  0x51   :  { %458 = vmatpush3.bf16.msra.mxu0 %v514_v2  ;;  %466 = vmatpush3.bf16.msra.mxu1 %v516_v6  ;;  %v416_v29 = vld [vmem:[%s850_s4] ss:$0 sm:$0xff] }
  0x52   :  { %483 = vmatprep.subr.bf16.mxu0 %v683_v0  ;;  %467 = vmatprep.subr.bf16.mxu1 %v683_v0  ;;  %p631_p8 = pnand %p630_p7, %p624_p4 }
  0x54   :  { %460 = vmatmul.mubr.msk.bf16.vlgmr.msra.gmra.mrb[0].mxu0 %vm109_vm1, %v85_v5 }
  0x55   :  { %499 = vmatprep.mubr.msk.bf16.mxu0 %vm684_vm0, %v683_v0  ;;  %468 = vmatpush3.bf16.msra.mxu1 %v517_v7 }
  0x56   :  { %469 = vmatprep.subr.bf16.mxu1 %v683_v0  ;;  %484 = vmatpush3.bf16.msra.mxu0 %v523_v13 }
  0x57   :  { %485 = vmatprep.subr.bf16.mxu0 %v683_v0 }
  0x59   :  { %470 = vmatpush3.bf16.msra.mxu1 %v518_v8 }
  0x5a   :  { %471 = vmatprep.subr.bf16.mxu1 %v683_v0  ;;  %486 = vmatpush3.bf16.msra.mxu0 %v524_v14 }
  0x5b   :  { %487 = vmatprep.subr.bf16.mxu0 %v683_v0 }
  0x5d   :  { %472 = vmatpush3.bf16.msra.mxu1 %v519_v9 }
  0x5e   :  { %473 = vmatprep.subr.bf16.mxu1 %v683_v0  ;;  %488 = vmatpush3.bf16.msra.mxu0 %v525_v15 }
  0x5f   :  { %489 = vmatprep.subr.bf16.mxu0 %v683_v0 }
  0x61   :  { %474 = vmatpush3.bf16.msra.mxu1 %v520_v10 }
  0x62   :  { %475 = vmatprep.subr.bf16.mxu1 %v683_v0  ;;  %490 = vmatpush3.bf16.msra.mxu0 %v526_v16 }
  0x63   :  { %491 = vmatprep.subr.bf16.mxu0 %v683_v0 }
  0x65   :  { %476 = vmatpush3.bf16.msra.mxu1 %v521_v11 }
  0x66   :  { %477 = vmatprep.subr.bf16.mxu1 %v683_v0  ;;  %492 = vmatpush3.bf16.msra.mxu0 %v527_v25 }
  0x67   :  { %493 = vmatprep.subr.bf16.mxu0 %v683_v0 }
  0x69   :  { %478 = vmatpush3.bf16.msra.mxu1 %v522_v12 }
  0x6a   :  { %494 = vmatpush3.bf16.msra.mxu0 %v528_v26 }
  0x6b   :  { %495 = vmatprep.subr.bf16.mxu0 %v683_v0 }
  0x6e   :  { %496 = vmatpush3.bf16.msra.mxu0 %v529_v27 }
  0x6f   :  { %497 = vmatprep.subr.bf16.mxu0 %v683_v0 }
  0x72   :  { %498 = vmatpush3.bf16.msra.mxu0 %v530_v28 }
 0x127   :  { %v147_v18 = vpop.f32.mrb[0].mxu0 }
 0x128   :  { %v148_v19 = vadd.f32 %v412_v17, %v147_v18  ;;  %v461_v20 = vpop.f32.mrb[1].mxu0 }
 0x129   :  { %v150_v21 = vpop.f32.mrb[2].mxu0 }
 0x12a   :  { %531 = vtanh.f32 %v148_v19  ;;  %v462_v22 = vpop.f32.mrb[3].mxu0 }
 0x134   :  { %v532_v23 = vpop.eup %531 }
 0x135   :  { %v154_v24 = vpack.c.bf16 %v532_v23, %v532_v23 }
 0x137   :  { %480 = vmatmul.mubr.bf16.vlgmr.msra.gmra.mrb[0].mxu1 %v154_v24 }
 0x20a   :  { %v260_v30 = vpop.f32.mrb[0].mxu1 }
 0x20b   :  { %v261_v31 = vadd.f32 %v416_v29, %v260_v30  ;;  %v481_v32 = vpop.f32.mrb[1].mxu1 }
 0x20c   :  { %v263_v33 = vpop.f32.mrb[2].mxu1 }
 0x20d   :  { %533 = vtanh.f32 %v261_v31  ;;  %v482_v34 = vpop.f32.mrb[3].mxu1 }
 0x217   :  { %v534_v35 = vpop.eup %533 }
 0x218   :  { %v267_v36 = vpack.c.bf16 %v534_v35, %v534_v35 }
 0x21a   :  { %379 = vst [vmem:[#allocation10] sm:$0xf] %v267_v36  ;;  %500 = vmatmul.mubr.bf16.vlgmr.msra.gmra.mrb[4].mxu0 %v267_v36 }
 0x21b   :  { %634 = shalt.err (!%p631_p8)
}
 0x21c   :  { %s635_s13 = scalar_lea.hbm %s853_s7, 64 }
 0x21d   :  { %p636_p9 = scmp.ne.s32.totalorder %s853_s7, %s635_s13  ;;  %p639_p10 = scmp.lt.u32.totalorder %s635_s13, %s853_s7 }
 0x21f   :  { %p641_p11 = pnand %p639_p10, %p636_p9 }
 0x221   :  { %644 = shalt.err (!%p641_p11)
}
 0x222   :  { %390 = dma.vmem_to_hbm [thread:$0]  %s388_s10, 64, %s853_s7, [#allocation4]   ;;  %v425_v37 = vld [vmem:[%s852_s6] ss:$0 sm:$0xff] }
 0x223   :  { %s686_s24 = smov [#allocation11]  }
 0x224   :  { %s397_s25 = sshll.u32 %s686_s24, 4  ;;  %s398_s25 = int_to_ptr.vmem [resolvable:$true] %s397_s25 }
 0x225   :  { %s645_s26 = scalar_lea.vmem %s398_s25, 128  ;;  %p650_p13 = scmp.lt.s32.totalorder %s398_s25, %s398_s25 }
 0x226   :  { %p646_p12 = scmp.ne.s32.totalorder %s398_s25, %s645_s26  ;;  %p651_p0 = scmp.lt.s32.totalorder %s645_s26, %s645_s26 }
 0x228   :  { %p652_p1 = por %p651_p0, %p650_p13 }
 0x22a   :  { %p653_p2 = pnand %p652_p1, %p646_p12 }
 0x2ed   :  { %v373_v38 = vpop.f32.mrb[4].mxu0 }
 0x2ee   :  { %v374_v39 = vadd.f32 %v425_v37, %v373_v38  ;;  %v501_v40 = vpop.f32.mrb[5].mxu0 }
 0x2ef   :  { %v376_v41 = vpop.f32.mrb[6].mxu0 }
 0x2f0   :  { %380 = vst [vmem:[#allocation11] sm:$0xff] %v374_v39  ;;  %v502_v42 = vpop.f32.mrb[7].mxu0 }
 0x2f1   :  { %656 = shalt.err (!%p653_p2)
}
 0x2f2   :  { %s657_s6 = scalar_lea.hbm %s854_s8, 128 }
 0x2f3   :  { %p658_p3 = scmp.ne.s32.totalorder %s854_s8, %s657_s6  ;;  %p661_p4 = scmp.lt.u32.totalorder %s657_s6, %s854_s8 }
 0x2f5   :  { %p663_p5 = pnand %p661_p4, %p658_p3 }
 0x2f7   :  { %666 = shalt.err (!%p663_p5)
}
 0x2f8   :  { %400 = dma.vmem_to_hbm [thread:$0]  %s398_s25, 128, %s854_s8, [#allocation12]  }
 0x2f9   :  { %673 = dma.done.wait [#allocation4], 64  }
 0x2fa   :  { %674 = vsyncadd [#allocation4], 4294967232 }
 0x2fb   :  { %675 = dma.done.wait [#allocation12], 128  }
 0x2fc   :  { %676 = vsyncadd [#allocation12], 4294967168 }
 0x2fd   :  { %407 = vsyncpa [#allocation3], 1 }
 0x2fe   :  { %408 = vsyncpa [#allocation6], 1 }
 0x2ff   :  { %409 = vsyncpa [#allocation9], 1 }
 0x300   :  { %410 = vsyncpa [#allocation4], 1 }
 0x301   :  { %411 = vsyncpa [#allocation12], 1 }

</bundles_post_ra>
